<compile_context>
chip_gen: v6e
topology: v6e:2x2x1
jax: 0.10.0
libtpu: 0.0.40
codegen_flags: <defaults>
</compile_context>

<pallas_src>
import functools

import jax
import jax.numpy as jnp
from jax.experimental import pallas as pl
from jax.experimental.pallas import tpu as pltpu


def _round_up(x, m):
    return ((x + m - 1) // m) * m


def _ce_kernel(pred_ref, label_ref, out_ref, *, n_valid, tile_n,
               labels_resident, compute_dtype):
    """One row tile: writes this tile's summed NLL into its own output block."""
    i = pl.program_id(0)

    x = pred_ref[...]                               # (tile_n, C), input dtype
    if x.dtype != compute_dtype:
        x = x.astype(compute_dtype)                 # f32 path (bf16 stays bf16)

    if labels_resident:
        start = pl.multiple_of(i * tile_n, tile_n)
        lbl = label_ref[pl.ds(start, tile_n), :]    # (tile_n, 1) from resident block
    else:
        lbl = label_ref[...]                        # (tile_n, 1) per-tile block

    # Numerically stable log-softmax in "shifted" space:
    #   nll = logsumexp(x) - x[label] = log(sum exp(x - m)) - (x[label] - m)
    m = jnp.max(x, axis=-1, keepdims=True)                        # (tile_n, 1)
    shifted = x - m                                               # compute dtype
    sum_exp = jnp.sum(jnp.exp(shifted), axis=-1, keepdims=True,
                      dtype=jnp.float32)                          # f32 (tile_n, 1)
    lse = jnp.log(sum_exp)                                        # f32 (tile_n, 1)

    # (1, C) iota broadcast against (tile_n, 1) labels: avoids materializing a
    # (tile_n, C) int32 tensor.  Only one element per row survives the select,
    # so summing in the compute dtype is exact; convert the (tile_n, 1) result.
    col = jax.lax.broadcasted_iota(jnp.int32, (1, x.shape[-1]), 1)
    picked = jnp.sum(jnp.where(col == lbl, shifted, 0),
                     axis=-1, keepdims=True).astype(jnp.float32)  # (tile_n, 1)

    per_row = lse - picked                                        # f32 (tile_n, 1)

    # Mask padded rows of a partial last tile.  Keep the select (NOT a
    # multiply): it discards any NaN/Inf produced by padded garbage rows.
    if n_valid % tile_n:
        row = jax.lax.broadcasted_iota(jnp.int32, per_row.shape, 0) + i * tile_n
        per_row = jnp.where(row < n_valid, per_row, 0.0)

    tile_sum = jnp.sum(per_row)                                   # f32 scalar
    # Lane-dense (8, 128) store (unmasked vst); wrapper reads [tile, 0, 0].
    out_ref[...] = jnp.full(out_ref.shape, tile_sum, dtype=jnp.float32)


def _vmem_budget():
    """(vmem_limit_bytes, working-set budget) tuned per TPU generation."""
    try:
        phys = int(pltpu.get_tpu_info().vmem_capacity_bytes)
    except Exception:
        phys = 64 * 1024 * 1024          # conservative (v7x-sized) fallback
    vmem_limit = min(phys * 3 // 4, 96 * 1024 * 1024)
    working = min(vmem_limit - 8 * 1024 * 1024, 48 * 1024 * 1024)
    return int(vmem_limit), int(max(working, 8 * 1024 * 1024))


def ce_loss(pred, label, tile_n=None, labels_resident=None):
    """pred: (N, C) float logits (f32 or bf16), label: (N,) int class ids.

    Returns (mean cross-entropy loss scalar, zeros((1,), f32)).
    """
    n, c = pred.shape
    compute_dtype = jnp.bfloat16 if pred.dtype == jnp.bfloat16 else jnp.float32

    vmem_limit, working = _vmem_budget()
    if tile_n is None:
        # Budget = double-buffered input tile + ~4 compute-dtype temporaries.
        in_b = pred.dtype.itemsize
        cp_b = jnp.dtype(compute_dtype).itemsize
        bytes_per_row = 2 * c * in_b + 4 * c * cp_b + 64
        rows = working // bytes_per_row
        tile_n = max(8, (rows // 8) * 8)
    tile_n = int(min(_round_up(int(tile_n), 8), _round_up(n, 8)))

    num_tiles = int(pl.cdiv(n, tile_n))
    n_pad = num_tiles * tile_n

    label2d = jnp.pad(label.astype(jnp.int32), (0, n_pad - n)).reshape(n_pad, 1)

    if labels_resident is None:
        # Resident labels cost ~n_pad * 512 B of VMEM (lane padding); only keep
        # them resident when that footprint is tiny, else stream per tile.
        labels_resident = n_pad * 512 <= 2 * 1024 * 1024

    if labels_resident:
        label_spec = pl.BlockSpec((n_pad, 1), lambda i: (0, 0))   # single DMA
    else:
        label_spec = pl.BlockSpec((tile_n, 1), lambda i: (i, 0))

    kernel = functools.partial(
        _ce_kernel, n_valid=n, tile_n=tile_n,
        labels_resident=bool(labels_resident), compute_dtype=compute_dtype)

    partials = pl.pallas_call(
        kernel,
        out_shape=jax.ShapeDtypeStruct((num_tiles, 8, 128), jnp.float32),
        grid=(num_tiles,),
        in_specs=[pl.BlockSpec((tile_n, c), lambda i: (i, 0)), label_spec],
        out_specs=pl.BlockSpec((1, 8, 128), lambda i: (i, 0, 0)),
        compiler_params=pltpu.CompilerParams(
            dimension_semantics=("parallel",),       # independent tiles -> megacore on v7x
            vmem_limit_bytes=vmem_limit,
        ),
        cost_estimate=pl.CostEstimate(
            flops=5 * n * c,
            transcendentals=n * c + n,
            bytes_accessed=n * c * pred.dtype.itemsize + n_pad * 4
                           + num_tiles * 8 * 128 * 4,
        ),
    )(pred, label2d)

    # Per-tile partial sums -> mean (pairwise-friendly, better precision than a
    # serial scalar accumulator for large N).
    loss = jnp.sum(partials[:, 0, 0]) / jnp.float32(n)
    zero = jnp.zeros((1,), jnp.float32)   # torch.Tensor([0]) equivalent
    return loss, zero


def _ref_ce(pred, label):
    n = pred.shape[0]
    pred32 = pred.astype(jnp.float32)
    return jnp.mean(
        jax.nn.logsumexp(pred32, axis=-1) - pred32[jnp.arange(n), label])


if __name__ == "__main__":
    key = jax.random.PRNGKey(0)
    k1, k2, k3, k4 = jax.random.split(key, 4)

    # Case 1: small batch, single tile, f32, resident labels.
    N, C = 8, 32
    pred = jax.random.normal(k1, (N, C), dtype=jnp.float32)
    label = jax.random.randint(k2, (N,), 0, C, dtype=jnp.int32)
    loss, zero = ce_loss(pred, label)
    jax.block_until_ready((loss, zero))
    ref = _ref_ce(pred, label)
    assert jnp.allclose(loss, ref, atol=1e-5), (loss, ref)
    assert zero.shape == (1,) and float(zero[0]) == 0.0

    # Case 2: multi-tile grid with a partial last tile (N % tile_n != 0).
    N2, C2 = 20, 128
    pred2 = jax.random.normal(k3, (N2, C2), dtype=jnp.float32)
    label2 = jax.random.randint(k4, (N2,), 0, C2, dtype=jnp.int32)
    loss2, zero2 = ce_loss(pred2, label2, tile_n=8)   # 3 row tiles
    jax.block_until_ready((loss2, zero2))
    ref2 = _ref_ce(pred2, label2)
    assert jnp.allclose(loss2, ref2, atol=1e-5), (loss2, ref2)
    assert zero2.shape == (1,) and float(zero2[0]) == 0.0

    # Case 2b: same inputs, streamed (non-resident) label path.
    loss2b, _ = ce_loss(pred2, label2, tile_n=8, labels_resident=False)
    jax.block_until_ready(loss2b)
    assert jnp.allclose(loss2b, ref2, atol=1e-5), (loss2b, ref2)

    # Case 3: bf16 hot path (v6e/v7x optimization), looser tolerance vs f32 ref.
    pred3 = pred2.astype(jnp.bfloat16)
    loss3, _ = ce_loss(pred3, label2, tile_n=8)
    jax.block_until_ready(loss3)
    ref3 = _ref_ce(pred3, label2)
    assert jnp.allclose(loss3, ref3, atol=7.5e-2, rtol=2e-2), (loss3, ref3)

    print("KERNEL_OK")
</pallas_src>

<mosaic_0001>
module attributes {stable_mosaic.version = 11 : i64} {
  func.func @_ce_kernel(%arg0: i32, %arg1: memref<8x32xf32, #tpu.memory_space<vmem>>, %arg2: memref<8x1xi32, #tpu.memory_space<vmem>>, %arg3: memref<1x8x128xf32, #tpu.memory_space<vmem>>) attributes {dimension_semantics = [#tpu.dimension_semantics<parallel>], iteration_bounds = array<i64: 1>, scalar_prefetch = 0 : i64, scratch_operands = 0 : i64, tpu.core_type = #tpu.core_type<tc>, window_params = [{transform_indices = @transform_0, window_bounds = array<i64: 8, 32>}, {pipeline_mode = #tpu.pipeline_mode<synchronous>, transform_indices = @transform_1, window_bounds = array<i64: 8, 1>}, {transform_indices = @transform_2, window_bounds = array<i64: 1, 8, 128>}]} {
    %c0 = arith.constant 0 : index
    %c0_0 = arith.constant 0 : index
    %0 = vector.load %arg1[%c0, %c0_0] : memref<8x32xf32, #tpu.memory_space<vmem>>, vector<8x32xf32>
    %c8_i32 = arith.constant 8 : i32
    %1 = arith.muli %arg0, %c8_i32 : i32
    %2 = tpu.assume_multiple %1, 8 : i32
    %3 = arith.index_cast %2 : i32 to index
    %c0_1 = arith.constant 0 : index
    %4 = vector.load %arg2[%3, %c0_1] : memref<8x1xi32, #tpu.memory_space<vmem>>, vector<8x1xi32>
    %cst = arith.constant dense<0xFF800000> : vector<8xf32>
    %5 = vector.multi_reduction <maximumf>, %0, %cst [1] : vector<8x32xf32> to vector<8xf32>
    %6 = vector.shape_cast %5 : vector<8xf32> to vector<8x1xf32>
    %7 = vector.broadcast %6 : vector<8x1xf32> to vector<8x32xf32>
    %8 = arith.subf %0, %7 : vector<8x32xf32>
    %9 = math.exp %8 : vector<8x32xf32>
    %cst_2 = arith.constant dense<0.000000e+00> : vector<8xf32>
    %10 = vector.multi_reduction <add>, %9, %cst_2 [1] : vector<8x32xf32> to vector<8xf32>
    %11 = vector.shape_cast %10 : vector<8xf32> to vector<8x1xf32>
    %12 = math.log %11 : vector<8x1xf32>
    %13 = tpu.iota {dimensions = array<i32: 1>} : vector<1x32xi32>
    %14 = vector.broadcast %13 : vector<1x32xi32> to vector<8x32xi32>
    %15 = vector.broadcast %4 : vector<8x1xi32> to vector<8x32xi32>
    %16 = arith.cmpi eq, %14, %15 : vector<8x32xi32>
    %c0_i32 = arith.constant 0 : i32
    %17 = arith.sitofp %c0_i32 : i32 to f32
    %18 = vector.broadcast %17 : f32 to vector<8x32xf32>
    %19 = arith.select %16, %8, %18 : vector<8x32xi1>, vector<8x32xf32>
    %cst_3 = arith.constant dense<0.000000e+00> : vector<8xf32>
    %20 = vector.multi_reduction <add>, %19, %cst_3 [1] : vector<8x32xf32> to vector<8xf32>
    %21 = vector.shape_cast %20 : vector<8xf32> to vector<8x1xf32>
    %22 = arith.subf %12, %21 : vector<8x1xf32>
    %23 = vector.shape_cast %22 : vector<8x1xf32> to vector<1x8x1xf32>
    %cst_4 = arith.constant dense<0.000000e+00> : vector<1xf32>
    %24 = vector.multi_reduction <add>, %23, %cst_4 [1, 2] : vector<1x8x1xf32> to vector<1xf32>
    %25 = vector.shape_cast %24 : vector<1xf32> to vector<1x1x1xf32>
    %26 = vector.extract %25[0, 0, 0] : f32 from vector<1x1x1xf32>
    %27 = vector.broadcast %26 : f32 to vector<1x8x128xf32>
    %c0_5 = arith.constant 0 : index
    %c0_6 = arith.constant 0 : index
    %c0_7 = arith.constant 0 : index
    %28 = vector.load %arg3[%c0_5, %c0_6, %c0_7] : memref<1x8x128xf32, #tpu.memory_space<vmem>>, vector<1x8x128xf32>
    tpu.vector_store %arg3[%c0_5, %c0_6, %c0_7], %27 {strides = array<i32>} : memref<1x8x128xf32, #tpu.memory_space<vmem>>, vector<1x8x128xf32>,
    return
  }
  func.func @transform_0(%arg0: i32) -> (i32, i32) {
    %c0_i32 = arith.constant 0 : i32
    %c0_i32_0 = arith.constant 0 : i32
    return %arg0, %c0_i32 : i32, i32
  }
  func.func @transform_1(%arg0: i32) -> (i32, i32) {
    %c0_i32 = arith.constant 0 : i32
    %c0_i32_0 = arith.constant 0 : i32
    %c0_i32_1 = arith.constant 0 : i32
    return %c0_i32, %c0_i32_0 : i32, i32
  }
  func.func @transform_2(%arg0: i32) -> (i32, i32, i32) {
    %c0_i32 = arith.constant 0 : i32
    %c0_i32_0 = arith.constant 0 : i32
    %c0_i32_1 = arith.constant 0 : i32
    return %arg0, %c0_i32, %c0_i32_0 : i32, i32, i32
  }
}

</mosaic_0001>

<bundles_post_ra>
// kernel: tpu_custom_call.1
= control target key start
LH: loop header
LB: loop body
LE: loop exit
PB: predicated region body
PF: predicated region fallthrough
CT: control target
= control target key end

     0   :  { %vm16_vm0 = vcmask 261120   ;;  %s126_s0 = inlined_call_operand.vmem [shape: f32[8,32], index: 0, kind: input, shape index: {}]   ;;  %s127_s1 = inlined_call_operand.vmem [shape: s32[8,1], index: 1, kind: input, shape index: {}]   ;;  %s128_s2 = inlined_call_operand.hbm [shape: f32[1,8,128], index: 2, kind: output, shape index: {}]  }
   0x1   :  { %v12_v0 = vld [vmem:[%s126_s0] sm:$0xff] }
   0x2   :  { %7 = vsyncpa [#allocation3], 0  ;;  %v17_v1 = vsel %vm16_vm0, %v12_v0, -inf  ;;  %v97_v2 = vmov 0   ;;  %v15_v3 = vld [vmem:[%s127_s1] sm:$0xff]  ;;  %v28_v7 = vlaneseq  ;;  %vm39_vm2 = vcmask 7168  }
   0x3   :  { %70 = vset.pattern.permute.xlu0 %v97_v2  ;;  %s98_s0 = smov [#allocation2]  }
   0x4   :  { %18 = vmax.xlane.f32.xlu0 %v17_v1  ;;  %v29_v8 = vand.u32 127, %v28_v7  ;;  %s58_s1 = sshll.u32 %s98_s0, 4  ;;  %s59_s1 = int_to_ptr.vmem [resolvable:$true] %s58_s1 }
   0x5   :  { %s75_s14 = scalar_lea.vmem %s59_s1, 128  ;;  %p80_p1 = scmp.lt.s32.totalorder %s59_s1, %s59_s1 }
   0x6   :  { %p76_p0 = scmp.ne.s32.totalorder %s59_s1, %s75_s14  ;;  %p81_p2 = scmp.lt.s32.totalorder %s75_s14, %s75_s14 }
   0x8   :  { %p82_p3 = por %p81_p2, %p80_p1 }
   0xa   :  { %p83_p4 = pnand %p82_p3, %p76_p0 }
  0x1a   :  { %31 = vperm.xlu0 %70, %v15_v3  }
  0x8d   :  { %v19_v4 = vpop.xlane.xlu0 %18 }
  0x8e   :  { %v20_v5 = vsub.f32 %v12_v0, %v19_v4 }
  0x90   :  { %v21_v6 = vmul.f32 1.442695, %v20_v5 }
  0x92   :  { %71 = vpow2.f32 %v21_v6 }
  0x95   :  { %v32_v9 = vpop.permute.xlu0 %31 }
  0x96   :  { %vm33_vm1 = vcmp.eq.s32.totalorder %v29_v8, %v32_v9 }
  0x97   :  { %v34_v12 = vsel %vm33_vm1, %v20_v5, 0.0 }
  0x98   :  { %v35_v13 = vsel %vm16_vm0, %v34_v12, 0.0 }
  0x9f   :  { %v72_v10 = vpop.eup %71 }
  0xa0   :  { %v23_v11 = vsel %vm16_vm0, %v72_v10, 0.0 }
  0xa1   :  { %24 = vadd.xlane.f32.xlu1 %v23_v11 }
  0xa5   :  { %36 = vadd.xlane.f32.xlu1 %v35_v13 }
 0x12a   :  { %v25_v14 = vpop.xlane.xlu1 %24 }
 0x12b   :  { %73 = vlog2.f32 %v25_v14 }
 0x12e   :  { %v37_v17 = vpop.xlane.xlu1 %36 }
 0x138   :  { %v74_v15 = vpop.eup %73 }
 0x139   :  { %v27_v16 = vmul.f32 0.6931472, %v74_v15 }
 0x13b   :  { %v38_v18 = vsub.f32 %v27_v16, %v37_v17 }
 0x13d   :  { %v40_v19 = vsel %vm39_vm2, %v38_v18, 0.0 }
 0x13e   :  { %41 = vadd.xlane.f32.xlu1 %v40_v19 }
 0x1c7   :  { %v42_v20 = vpop.xlane.xlu1 %41 }
 0x1c8   :  { %v43_v21 = vrot.slane %v42_v20, 4 }
 0x1ca   :  { %v44_v22 = vadd.f32 %v43_v21, %v42_v20 }
 0x1cc   :  { %v45_v23 = vrot.slane %v44_v22, 2 }
 0x1ce   :  { %v46_v24 = vadd.f32 %v45_v23, %v44_v22 }
 0x1d0   :  { %v47_v25 = vrot.slane %v46_v24, 1 }
 0x1d2   :  { %v48_v26 = vadd.f32 %v47_v25, %v46_v24 }
 0x1d4   :  { %66 = vpush %v48_v26 }
 0x205   :  { %s67_s13 = spop %66 }
 0x206   :  { %v50_v27 = vstv %s67_s13 }
 0x207   :  { %51 = vst [vmem:[#allocation2] sm:$0xff] %v50_v27 }
 0x208   :  { %86 = shalt.err (!%p83_p4)
}
 0x209   :  { %61 = dma.vmem_to_hbm [thread:$0]  %s59_s1, 128, %s128_s2, [#allocation3]  }
 0x20a   :  { %95 = dma.done.wait [#allocation3], 128  }
 0x20b   :  { %96 = vsyncadd [#allocation3], 4294967168 }
 0x20c   :  { %65 = vsyncpa [#allocation3], 1 }

</bundles_post_ra>
